<compile_context>
chip_gen: v7x
topology: tpu7x:2x2x1
jax: 0.10.0
libtpu: 0.0.40
codegen_flags: <defaults>
</compile_context>

<pallas_src>
import math
import functools

import jax
import jax.numpy as jnp
from jax import lax
from jax.experimental import pallas as pl
from jax.experimental.pallas import tpu as pltpu

LN_EPS = 1e-6  # torchvision ViT uses LayerNorm(eps=1e-6)


# ----------------------------- shared math helpers ---------------------------

def _layernorm(x, g, b):
    mu = jnp.mean(x, axis=-1, keepdims=True)
    var = jnp.mean((x - mu) ** 2, axis=-1, keepdims=True)
    return (x - mu) * lax.rsqrt(var + LN_EPS) * g + b


def _gelu_tanh(x):
    # tanh-form GELU: tanh runs on the EUP slot; |err| vs exact erf-GELU < 1e-3.
    c = math.sqrt(2.0 / math.pi)
    return 0.5 * x * (1.0 + jnp.tanh(c * (x + 0.044715 * x * x * x)))


def _gelu_ref(x):
    # exact (erf-based) GELU, matching torch.nn.GELU() default — reference only.
    return 0.5 * x * (1.0 + lax.erf(x * (1.0 / math.sqrt(2.0))))


# --------------------------------- kernels -----------------------------------

def patch_proj_kernel(p_ref, w_ref, b_ref, o_ref):
    # (rows, K)bf16 @ (K, D)bf16 + (1, D)f32: conv_proj(kernel=stride=patch).
    o_ref[...] = (
        jnp.dot(p_ref[...], w_ref[...], preferred_element_type=jnp.float32)
        + b_ref[...]
    )


# rows of the packed per-layer vector operand (L, 9, D)
V_LN1G, V_LN1B, V_BQ, V_BK, V_BV, V_BO, V_LN2G, V_LN2B, V_B2 = range(9)


def fused_encoder_kernel(x0_ref, mask_ref, lnf_g_ref, lnf_b_ref, vecs_ref,
                         wq_ref, wk_ref, wv_ref, wo_ref,
                         w1_ref, b1_ref, w2_ref,
                         o_ref, x_scr, *, num_heads, seq_pad):
    layer = pl.program_id(1)
    R, D = x_scr.shape                      # R = local batch rows * seq_pad
    B = R // seq_pad
    H = num_heads
    hd = D // H
    scale = 1.0 / math.sqrt(hd)
    bf16 = jnp.bfloat16

    # Load the initial (padded) token embeddings once; activations then stay
    # resident in VMEM across all layer iterations (no HBM roundtrip).
    @pl.when(layer == 0)
    def _():
        x_scr[...] = x0_ref[...]

    x = x_scr[...]                                        # (R, D) f32
    vecs = vecs_ref[...]                                  # (9, D) f32 packed

    # ---- LN1 + batched multi-head self-attention ----
    xh = _layernorm(x, vecs[V_LN1G:V_LN1G + 1], vecs[V_LN1B:V_LN1B + 1]).astype(bf16)
    q = jnp.dot(xh, wq_ref[...], preferred_element_type=jnp.float32) + vecs[V_BQ:V_BQ + 1]
    k = jnp.dot(xh, wk_ref[...], preferred_element_type=jnp.float32) + vecs[V_BK:V_BK + 1]
    v = jnp.dot(xh, wv_ref[...], preferred_element_type=jnp.float32) + vecs[V_BV:V_BV + 1]

    def split_heads(t):
        # (R, D) -> (H, R, hd) via H static lane slices, then fold the batch
        # rows in at a sublane-tile boundary: (H, B*Sp, hd) -> (H*B, Sp, hd).
        hs = jnp.stack(jnp.split(t, H, axis=1), axis=0)
        return hs.reshape(H * B, seq_pad, hd).astype(bf16)

    qb, kb, vb = split_heads(q), split_heads(k), split_heads(v)

    # Two batched MXU einsums over the fused (head, batch) dim — replaces the
    # old per-(batch, head) unrolled dots and masked scatter stores.
    s = jnp.einsum('bqd,bkd->bqk', qb, kb,
                   preferred_element_type=jnp.float32) * scale
    s = s + mask_ref[...]                                 # additive -1e30 on padded keys
    s = s - jnp.max(s, axis=-1, keepdims=True)
    p = jnp.exp(s)
    p = p * pl.reciprocal(jnp.sum(p, axis=-1, keepdims=True), approx=True)
    o = jnp.einsum('bqk,bkd->bqd', p.astype(bf16), vb,
                   preferred_element_type=jnp.float32)    # (H*B, Sp, hd) f32

    # Head merge fused into the output projection: wo is pre-split (H, hd, D),
    # so the concat over heads becomes a batched matmul + sum over H.
    oh = o.reshape(H, R, hd).astype(bf16)                 # (H, R, hd)
    attn = jnp.einsum('hrk,hkd->hrd', oh, wo_ref[...],
                      preferred_element_type=jnp.float32)
    attn = jnp.sum(attn, axis=0) + vecs[V_BO:V_BO + 1]    # (R, D)
    x1 = x + attn                                         # residual (f32)

    # ---- LN2 + MLP (Linear -> GELU(tanh) -> Linear) ----
    yh = _layernorm(x1, vecs[V_LN2G:V_LN2G + 1], vecs[V_LN2B:V_LN2B + 1]).astype(bf16)
    h1 = jnp.dot(yh, w1_ref[...], preferred_element_type=jnp.float32) + b1_ref[...]
    h1 = _gelu_tanh(h1).astype(bf16)
    h2 = jnp.dot(h1, w2_ref[...], preferred_element_type=jnp.float32) + vecs[V_B2:V_B2 + 1]
    x_new = x1 + h2                                       # residual (f32)

    x_scr[...] = x_new

    # Last layer: apply the encoder's final LayerNorm and emit.
    @pl.when(layer == pl.num_programs(1) - 1)
    def _():
        o_ref[...] = _layernorm(x_new, lnf_g_ref[...], lnf_b_ref[...])


# ------------------------------- pallas wrappers ------------------------------

def patch_proj(patches_bf16, w_bf16, b_f32):
    R, K = patches_bf16.shape
    D = w_bf16.shape[1]
    tm = min(256, R)     # row tile: pipelines HBM loads vs MXU for large images
    return pl.pallas_call(
        patch_proj_kernel,
        out_shape=jax.ShapeDtypeStruct((R, D), jnp.float32),
        grid=(pl.cdiv(R, tm),),
        in_specs=[pl.BlockSpec((tm, K), lambda i: (i, 0)),
                  pl.BlockSpec((K, D), lambda i: (0, 0)),
                  pl.BlockSpec((1, D), lambda i: (0, 0))],
        out_specs=pl.BlockSpec((tm, D), lambda i: (i, 0)),
        compiler_params=pltpu.CompilerParams(dimension_semantics=("parallel",)),
    )(patches_bf16, w_bf16, b_f32)


def encoder_forward(x0_2d, prep, *, seq_pad, num_row_shards):
    R, D = x0_2d.shape
    NC = num_row_shards
    Rl = R // NC                            # rows per core shard
    L = prep["wq"].shape[0]
    M = prep["w1"].shape[-1]
    H = prep["num_heads"]
    hd = D // H

    def rep(shape):                  # layer/core-invariant operand (fetched once)
        return pl.BlockSpec(shape, lambda c, l: (0,) * len(shape))

    def per_layer(shape):            # (L, ...) stacked operand, streamed per layer
        return pl.BlockSpec((None,) + shape, lambda c, l: (l,) + (0,) * len(shape))

    kern = functools.partial(fused_encoder_kernel, num_heads=H, seq_pad=seq_pad)
    # TODO(synk): for real ViT-B sizes (D=768, M=3072, B large) the MLP/QKV
    # weight blocks must additionally be M-tiled and the resident f32 activation
    # slab re-derived against v7x's 64 MiB VMEM (bf16 residual / row tiling);
    # on v5e/v6e just raise vmem_limit_bytes. At these toy sizes full blocks fit.
    return pl.pallas_call(
        kern,
        out_shape=jax.ShapeDtypeStruct((R, D), jnp.float32),
        grid=(NC, L),
        in_specs=[
            pl.BlockSpec((Rl, D), lambda c, l: (c, 0)),    # x0 row shard
            rep((seq_pad, seq_pad)),                       # additive key mask
            rep((1, D)), rep((1, D)),                      # final LN gamma / beta
            per_layer((9, D)),                             # packed per-layer vectors
            per_layer((D, D)), per_layer((D, D)), per_layer((D, D)),  # wq wk wv
            per_layer((H, hd, D)),                         # wo, pre-split per head
            per_layer((D, M)), per_layer((1, M)),          # mlp fc1 w / b
            per_layer((M, D)),                             # mlp fc2 w
        ],
        out_specs=pl.BlockSpec((Rl, D), lambda c, l: (c, 0)),
        scratch_shapes=[pltpu.VMEM((Rl, D), jnp.float32)], # resident activations
        compiler_params=pltpu.CompilerParams(
            dimension_semantics=("parallel", "arbitrary"), # cores x layers
            vmem_limit_bytes=32 * 1024 * 1024),
    )(
        x0_2d, prep["mask"], prep["ln_g"], prep["ln_b"], prep["vecs"],
        prep["wq"], prep["wk"], prep["wv"], prep["wo_h"],
        prep["w1"], prep["b1"], prep["w2"],
    )


def _num_row_shards(batch):
    # v7x has 2 TensorCores per chip: shard the batch rows across them via the
    # leading "parallel" grid axis. v5e/v6e (1 TC) keep a single shard so
    # per-layer weights are only streamed once.
    try:
        kind = jax.devices()[0].device_kind.lower()
    except Exception:
        kind = ""
    cores = 2 if ("v7" in kind or "7x" in kind) else 1
    while cores > 1 and batch % cores != 0:
        cores -= 1
    return cores


def vit_backbone_forward(x_nchw, prep):
    B, C, Hh, Ww = x_nchw.shape
    p = prep["patch"]
    Hp, Wp = Hh // p, Ww // p
    P = Hp * Wp
    D = prep["conv_w_flat"].shape[1]
    S = prep["seq_len"]
    S_pad = prep["seq_pad"]
    assert S == P + 1, "image size inconsistent with pos_embedding"

    # conv_proj(kernel=stride=patch) == matmul over (C*p*p)-flattened patches;
    # the slab is emitted in bf16 so the kernel reads half the HBM bytes.
    # TODO(synk): for large images fold this extraction into patch_proj's
    # index_map (strided NCHW reads) instead of materializing the slab in HBM.
    patches = x_nchw.reshape(B, C, Hp, p, Wp, p).transpose(0, 2, 4, 1, 3, 5)
    patches = patches.reshape(B * P, C * p * p).astype(jnp.bfloat16)
    tokens = patch_proj(patches, prep["conv_w_flat"], prep["conv_b"])
    tokens = tokens.reshape(B, P, D)

    cls = jnp.broadcast_to(prep["class_token"], (B, 1, D))
    x = jnp.concatenate([cls, tokens], axis=1) + prep["pos_embedding"]
    # TODO(synk): dropout layers are inference no-ops and are omitted.
    # TODO(synk): cls/pos/pad could be folded into the layer==0 branch of the
    # fused encoder to drop this small HBM roundtrip of the token tensor.
    x = jnp.pad(x, ((0, 0), (0, S_pad - S), (0, 0)))                  # (B, S_pad, D)
    x0 = x.reshape(B * S_pad, D)                                      # dense 2D slab

    out2d = encoder_forward(x0, prep, seq_pad=S_pad,
                            num_row_shards=_num_row_shards(B))
    return out2d.reshape(B, S_pad, D)[:, 0, :]                        # CLS token


# ------------------------------ params / reference ----------------------------

def init_params(key, *, C=3, img=16, patch=8, D=32, heads=4, M=128, L=2):
    # synthetic deterministic init; weights stored f32 in x @ W (row-vector)
    # layout, stacked over the layer axis.
    ks = iter(jax.random.split(key, 32))
    nrm = lambda shape, s=0.02: (s * jax.random.normal(next(ks), shape)).astype(jnp.float32)
    S = (img // patch) ** 2 + 1
    return dict(
        patch=patch, num_heads=heads,
        conv_w=nrm((D, C, patch, patch)),
        conv_b=nrm((D,)),
        class_token=nrm((1, 1, D)),
        pos_embedding=nrm((1, S, D)),
        ln_g=(1.0 + nrm((1, D), 0.05)), ln_b=nrm((1, D)),
        ln1_g=(1.0 + nrm((L, 1, D), 0.05)), ln1_b=nrm((L, 1, D)),
        wq=nrm((L, D, D)), wk=nrm((L, D, D)), wv=nrm((L, D, D)),
        bq=nrm((L, 1, D)), bk=nrm((L, 1, D)), bv=nrm((L, 1, D)),
        wo=nrm((L, D, D)), bo=nrm((L, 1, D)),
        ln2_g=(1.0 + nrm((L, 1, D), 0.05)), ln2_b=nrm((L, 1, D)),
        w1=nrm((L, D, M)), b1=nrm((L, 1, M)),
        w2=nrm((L, M, D)), b2=nrm((L, 1, D)),
    )


def prepare_params(params):
    # One-time, per-model preprocessing (NOT per forward): bf16 weight casts,
    # per-head split of wo, packed per-layer vectors, precomputed softmax mask.
    bf16 = jnp.bfloat16
    D = params["conv_w"].shape[0]
    L = params["wq"].shape[0]
    H = params["num_heads"]
    hd = D // H
    S = params["pos_embedding"].shape[1]
    S_pad = ((S + 7) // 8) * 8          # pad token count to a sublane multiple

    vec_names = ("ln1_g", "ln1_b", "bq", "bk", "bv", "bo", "ln2_g", "ln2_b", "b2")
    vecs = jnp.concatenate([params[k] for k in vec_names], axis=1)    # (L, 9, D)

    key_ok = (jnp.arange(S_pad) < S)[None, :]
    mask = jnp.broadcast_to(jnp.where(key_ok, 0.0, -1e30).astype(jnp.float32),
                            (S_pad, S_pad))

    return dict(
        patch=params["patch"], num_heads=H, seq_len=S, seq_pad=S_pad,
        conv_w_flat=params["conv_w"].reshape(D, -1).T.astype(bf16),   # (K, D)
        conv_b=params["conv_b"].reshape(1, D),
        class_token=params["class_token"], pos_embedding=params["pos_embedding"],
        mask=mask,
        ln_g=params["ln_g"], ln_b=params["ln_b"],
        vecs=vecs,
        wq=params["wq"].astype(bf16), wk=params["wk"].astype(bf16),
        wv=params["wv"].astype(bf16),
        wo_h=params["wo"].reshape(L, H, hd, D).astype(bf16),
        w1=params["w1"].astype(bf16), b1=params["b1"],
        w2=params["w2"].astype(bf16),
    )


def reference_forward(x_nchw, params):
    B, C, Hh, Ww = x_nchw.shape
    p = params["patch"]
    Hp, Wp = Hh // p, Ww // p
    P = Hp * Wp
    D = params["conv_w"].shape[0]
    nh = params["num_heads"]
    hd = D // nh
    patches = x_nchw.reshape(B, C, Hp, p, Wp, p).transpose(0, 2, 4, 1, 3, 5)
    patches = patches.reshape(B, P, C * p * p)
    tokens = patches @ params["conv_w"].reshape(D, -1).T + params["conv_b"]
    cls = jnp.broadcast_to(params["class_token"], (B, 1, D))
    x = jnp.concatenate([cls, tokens], axis=1) + params["pos_embedding"]
    S = x.shape[1]
    L = params["wq"].shape[0]
    for i in range(L):
        xh = _layernorm(x, params["ln1_g"][i], params["ln1_b"][i])
        q = xh @ params["wq"][i] + params["bq"][i]
        k = xh @ params["wk"][i] + params["bk"][i]
        v = xh @ params["wv"][i] + params["bv"][i]
        q = q.reshape(B, S, nh, hd).transpose(0, 2, 1, 3)
        k = k.reshape(B, S, nh, hd).transpose(0, 2, 1, 3)
        v = v.reshape(B, S, nh, hd).transpose(0, 2, 1, 3)
        s = jnp.einsum("bhqd,bhkd->bhqk", q, k) / math.sqrt(hd)
        pr = jax.nn.softmax(s, axis=-1)
        a = jnp.einsum("bhqk,bhkd->bhqd", pr, v).transpose(0, 2, 1, 3).reshape(B, S, D)
        a = a @ params["wo"][i] + params["bo"][i]
        x1 = x + a
        yh = _layernorm(x1, params["ln2_g"][i], params["ln2_b"][i])
        h = _gelu_ref(yh @ params["w1"][i] + params["b1"][i])
        x = x1 + h @ params["w2"][i] + params["b2"][i]
    x = _layernorm(x, params["ln_g"], params["ln_b"])
    return x[:, 0]


# ------------------------------------ main ------------------------------------

if __name__ == "__main__":
    key = jax.random.PRNGKey(0)
    kp, kx = jax.random.split(key)
    params = init_params(kp)                       # D=32, heads=4, mlp=128, L=2, patch=8
    prep = prepare_params(params)                  # one-time bf16 casts / packing
    x = jax.random.normal(kx, (2, 3, 16, 16), dtype=jnp.float32)   # NCHW image input

    out = jax.block_until_ready(vit_backbone_forward(x, prep))
    ref = reference_forward(x, params)

    assert out.shape == (2, 32), out.shape
    err = float(jnp.max(jnp.abs(out - ref)))
    # bf16 MXU inputs + tanh-GELU + approx reciprocal => looser tolerance than all-f32
    assert jnp.allclose(out, ref, atol=3e-2, rtol=3e-2), err
    print("KERNEL_OK")
</pallas_src>

<mosaic_0001>
module attributes {stable_mosaic.version = 11 : i64} {
  func.func @patch_proj_kernel(%arg0: i32, %arg1: memref<8x192xbf16, #tpu.memory_space<vmem>>, %arg2: memref<192x32xbf16, #tpu.memory_space<vmem>>, %arg3: memref<1x32xf32, #tpu.memory_space<vmem>>, %arg4: memref<8x32xf32, #tpu.memory_space<vmem>>) attributes {dimension_semantics = [#tpu.dimension_semantics<parallel>], iteration_bounds = array<i64: 1>, scalar_prefetch = 0 : i64, scratch_operands = 0 : i64, tpu.core_type = #tpu.core_type<tc>, window_params = [{transform_indices = @transform_0, window_bounds = array<i64: 8, 192>}, {pipeline_mode = #tpu.pipeline_mode<synchronous>, transform_indices = @transform_1, window_bounds = array<i64: 192, 32>}, {pipeline_mode = #tpu.pipeline_mode<synchronous>, transform_indices = @transform_2, window_bounds = array<i64: 1, 32>}, {transform_indices = @transform_3, window_bounds = array<i64: 8, 32>}]} {
    %c0 = arith.constant 0 : index
    %c0_0 = arith.constant 0 : index
    %0 = vector.load %arg1[%c0, %c0_0] : memref<8x192xbf16, #tpu.memory_space<vmem>>, vector<8x192xbf16>
    %c0_1 = arith.constant 0 : index
    %c0_2 = arith.constant 0 : index
    %1 = vector.load %arg2[%c0_1, %c0_2] : memref<192x32xbf16, #tpu.memory_space<vmem>>, vector<192x32xbf16>
    %cst = arith.constant dense<0.000000e+00> : vector<8x32xf32>
    %2 = tpu.matmul %0, %1, %cst {dimension_numbers = #tpu.dot_dimension_numbers<[1], [0], [0], [1], [0, 0, 1, 1], [], []>} : vector<8x192xbf16>, vector<192x32xbf16>, vector<8x32xf32> -> vector<8x32xf32>
    %c0_3 = arith.constant 0 : index
    %c0_4 = arith.constant 0 : index
    %3 = vector.load %arg3[%c0_3, %c0_4] : memref<1x32xf32, #tpu.memory_space<vmem>>, vector<1x32xf32>
    %4 = vector.broadcast %3 : vector<1x32xf32> to vector<8x32xf32>
    %5 = arith.addf %2, %4 : vector<8x32xf32>
    %c0_5 = arith.constant 0 : index
    %c0_6 = arith.constant 0 : index
    %6 = vector.load %arg4[%c0_5, %c0_6] : memref<8x32xf32, #tpu.memory_space<vmem>>, vector<8x32xf32>
    tpu.vector_store %arg4[%c0_5, %c0_6], %5 {strides = array<i32>} : memref<8x32xf32, #tpu.memory_space<vmem>>, vector<8x32xf32>,
    return
  }
  func.func @transform_0(%arg0: i32) -> (i32, i32) {
    %c0_i32 = arith.constant 0 : i32
    %c0_i32_0 = arith.constant 0 : i32
    return %arg0, %c0_i32 : i32, i32
  }
  func.func @transform_1(%arg0: i32) -> (i32, i32) {
    %c0_i32 = arith.constant 0 : i32
    %c0_i32_0 = arith.constant 0 : i32
    %c0_i32_1 = arith.constant 0 : i32
    return %c0_i32, %c0_i32_0 : i32, i32
  }
  func.func @transform_2(%arg0: i32) -> (i32, i32) {
    %c0_i32 = arith.constant 0 : i32
    %c0_i32_0 = arith.constant 0 : i32
    %c0_i32_1 = arith.constant 0 : i32
    return %c0_i32, %c0_i32_0 : i32, i32
  }
  func.func @transform_3(%arg0: i32) -> (i32, i32) {
    %c0_i32 = arith.constant 0 : i32
    %c0_i32_0 = arith.constant 0 : i32
    return %arg0, %c0_i32 : i32, i32
  }
}

</mosaic_0001>

<bundles_post_ra>
// kernel: tpu_custom_call.1
= control target key start
LH: loop header
LB: loop body
LE: loop exit
PB: predicated region body
PF: predicated region fallthrough
CT: control target
= control target key end

     0   :  { %v242_v1 = vmov 0   ;;  %vm126_vm0 = vcmask 523264   ;;  %s318_s0 = inlined_call_operand.vmem [shape: bf16[8,192], index: 0, kind: input, shape index: {}]   ;;  %s319_s1 = inlined_call_operand.vmem [shape: bf16[192,32], index: 1, kind: input, shape index: {}]   ;;  %s320_s2 = inlined_call_operand.vmem [shape: f32[1,32], index: 2, kind: input, shape index: {}]   ;;  %s321_s3 = inlined_call_operand.hbm [shape: f32[8,32], index: 3, kind: output, shape index: {}]  }
   0x1   :  { %v204_v0 = vld [vmem:[%s319_s1] sm:$0xff]   ;;  %130 = vmatprep.subr.bf16.mxu0 %v242_v1  ;;  %v205_v2 = vld [vmem:[%s319_s1 + $0x8] sm:$0xff]   ;;  %v206_v3 = vld [vmem:[%s319_s1 + $0x10] sm:$0xff]  }
   0x2   :  { %131 = vmatpush1.bf16.msra.mxu0 %v204_v0  ;;  %v207_v4 = vld [vmem:[%s319_s1 + $0x18] sm:$0xff]   ;;  %v16_v5 = vld [vmem:[%s318_s0] sm:$0xff] }
   0x3   :  { %132 = vmatprep.subr.bf16.mxu0 %v242_v1 }
   0x6   :  { %133 = vmatpush1.bf16.msra.mxu0 %v205_v2 }
   0x7   :  { %134 = vmatprep.subr.bf16.mxu0 %v242_v1 }
   0xa   :  { %135 = vmatpush1.bf16.msra.mxu0 %v206_v3 }
   0xb   :  { %136 = vmatprep.subr.bf16.mxu0 %v242_v1 }
   0xc   :  { %8 = vsyncpa [#allocation3], 0  ;;  %v188_v6 = vcombine.high %v16_v5, %v16_v5  ;;  %v208_v7 = vld [vmem:[%s319_s1 + $0x20] sm:$0xff]   ;;  %v209_v8 = vld [vmem:[%s319_s1 + $0x28] sm:$0xff]   ;;  %v187_v15 = vcombine.low %v16_v5, %v16_v5  ;;  %s243_s12 = smov [#allocation2]   ;;  %vm170_vm1 = vcmask 261120  }
   0xd   :  { %v210_v9 = vld [vmem:[%s319_s1 + $0x30] sm:$0xff]   ;;  %v211_v10 = vld [vmem:[%s319_s1 + $0x38] sm:$0xff]   ;;  %v212_v11 = vld [vmem:[%s319_s1 + $0x40] sm:$0xff]   ;;  %s178_s13 = sshll.u32 %s243_s12, 4  ;;  %s179_s13 = int_to_ptr.vmem [resolvable:$true] %s178_s13 }
   0xe   :  { %137 = vmatpush1.bf16.msra.mxu0 %v207_v4  ;;  %201 = vmatprep.mubr.msk.bf16.mxu0 %vm126_vm0, %v188_v6  ;;  %v213_v12 = vld [vmem:[%s319_s1 + $0x48] sm:$0xff]   ;;  %v214_v13 = vld [vmem:[%s319_s1 + $0x50] sm:$0xff]   ;;  %v215_v14 = vld [vmem:[%s319_s1 + $0x58] sm:$0xff]   ;;  %s218_s14 = scalar_lea.vmem %s179_s13, 128  ;;  %p223_p1 = scmp.lt.s32.totalorder %s179_s13, %s179_s13 }
   0xf   :  { %138 = vmatprep.subr.bf16.mxu0 %v242_v1  ;;  %v186_v16 = vld [vmem:[%s320_s2] ss:$0 sm:$0xff]  ;;  %p219_p0 = scmp.ne.s32.totalorder %s179_s13, %s218_s14  ;;  %p224_p2 = scmp.lt.s32.totalorder %s218_s14, %s218_s14 }
  0x11   :  { %p225_p3 = por %p224_p2, %p223_p1 }
  0x12   :  { %139 = vmatpush1.bf16.msra.mxu0 %v208_v7 }
  0x13   :  { %140 = vmatprep.subr.bf16.mxu0 %v242_v1  ;;  %p226_p4 = pnand %p225_p3, %p219_p0 }
  0x16   :  { %141 = vmatpush1.bf16.msra.mxu0 %v209_v8 }
  0x17   :  { %142 = vmatprep.subr.bf16.mxu0 %v242_v1 }
  0x1a   :  { %143 = vmatpush1.bf16.msra.mxu0 %v210_v9 }
  0x1b   :  { %144 = vmatprep.subr.bf16.mxu0 %v242_v1 }
  0x1e   :  { %145 = vmatpush1.bf16.msra.mxu0 %v211_v10 }
  0x1f   :  { %146 = vmatprep.subr.bf16.mxu0 %v242_v1 }
  0x22   :  { %147 = vmatpush1.bf16.msra.mxu0 %v212_v11 }
  0x23   :  { %148 = vmatprep.subr.bf16.mxu0 %v242_v1 }
  0x26   :  { %149 = vmatpush1.bf16.msra.mxu0 %v213_v12 }
  0x27   :  { %150 = vmatprep.subr.bf16.mxu0 %v242_v1 }
  0x2a   :  { %151 = vmatpush1.bf16.msra.mxu0 %v214_v13 }
  0x2b   :  { %152 = vmatprep.subr.bf16.mxu0 %v242_v1 }
  0x2e   :  { %153 = vmatpush1.bf16.msra.mxu0 %v215_v14 }
  0x31   :  { %163 = vmatmul.mubr.bf16.vlgmr.msra.gmra.mrb[0].mxu0 %v187_v15 }
 0x104   :  { %v164_v17 = vpop.f32.mrb[0].mxu0 }
 0x105   :  { %v165_v18 = vadd.f32 %v186_v16, %v164_v17  ;;  %v166_v19 = vpop.f32.mrb[1].mxu0 }
 0x106   :  { %v167_v20 = vpop.f32.mrb[2].mxu0 }
 0x107   :  { %v168_v21 = vpop.f32.mrb[3].mxu0  ;;  %171 = vst.msk [vmem:[#allocation2] sm:$0xff] %vm170_vm1, %v165_v18 }
 0x108   :  { %229 = shalt.err (!%p226_p4)
}
 0x109   :  { %s230_s2 = scalar_lea.hbm %s321_s3, 128 }
 0x10a   :  { %p231_p5 = scmp.ne.s32.totalorder %s321_s3, %s230_s2  ;;  %p234_p6 = scmp.lt.u32.totalorder %s230_s2, %s321_s3 }
 0x10c   :  { %p236_p7 = pnand %p234_p6, %p231_p5 }
 0x10e   :  { %239 = shalt.err (!%p236_p7)
}
 0x10f   :  { %181 = dma.vmem_to_hbm [thread:$0]  %s179_s13, 128, %s321_s3, [#allocation3]  }
 0x110   :  { %240 = dma.done.wait [#allocation3], 128  }
 0x111   :  { %241 = vsyncadd [#allocation3], 4294967168 }
 0x112   :  { %185 = vsyncpa [#allocation3], 1 }

</bundles_post_ra>
